<compile_context>
chip_gen: v6e
topology: v6e:2x2x1
jax: 0.10.0
libtpu: 0.0.40
codegen_flags: <defaults>
</compile_context>

<pallas_src>
import jax
import jax.numpy as jnp
from jax.experimental import pallas as pl
from jax.experimental.pallas import tpu as pltpu

# Problem sizes (match the PyTorch module: Conv2d(16, 33, 3, stride=2)).
N, CIN, H, W = 2, 16, 16, 16
COUT, KH, KW = 33, 3, 3
STRIDE = 2
HO = (H - KH) // STRIDE + 1              # 7
WO = (W - KW) // STRIDE + 1              # 7
NP = N * HO * WO                         # 98 output pixels (GEMM M dim)
K = KH * KW * CIN                        # 144 contraction depth (left unpadded)

# Padded GEMM dims for clean TPU layouts.
NP_PAD = ((NP + 7) // 8) * 8             # 104: 8-aligned sublanes on M
COUT_PAD = 128                           # lane-dense output (multiple of 128)


def conv_gemm_kernel(p_ref, w_ref, b_ref, o_ref):
    """Single-step fused conv-as-GEMM.

    p_ref: (NP_PAD, K)        bf16 im2col patches (zero-padded rows)
    w_ref: (K, COUT_PAD)      bf16 reshaped conv weights (zero-padded channels)
    b_ref: (1, COUT_PAD)      f32 bias (zero-padded channels)
    o_ref: (NP_PAD, COUT_PAD) f32 output
    """
    acc = jnp.dot(p_ref[...], w_ref[...], preferred_element_type=jnp.float32)
    # f32 epilogue (bias + ReLU); padded COUT columns stay >= 0 garbage-free
    # only up to ReLU(bias)=0 there since bias pad is 0.  Padded M rows
    # (98..103) hold ReLU(bias) and are sliced off in the wrapper.
    o_ref[...] = jnp.maximum(acc + b_ref[...], 0.0).astype(o_ref.dtype)


def prepare_conv_params(w_oihw, bias):
    """One-time parameter layout (hoisted out of the per-call path).

    Row order of w_mat is (cin, kh, kw) with cin major, matching the column
    order produced by conv_general_dilated_patches below.
    """
    w_mat = jnp.transpose(w_oihw, (1, 2, 3, 0)).reshape(K, COUT)       # (K, COUT)
    w_mat = jnp.pad(w_mat, ((0, 0), (0, COUT_PAD - COUT)))
    w_mat = w_mat.astype(jnp.bfloat16)                                 # bf16 MXU operand
    b2d = jnp.pad(bias.reshape(1, COUT),
                  ((0, 0), (0, COUT_PAD - COUT))).astype(jnp.float32)  # f32 epilogue
    return w_mat, b2d


def conv2d_relu_pallas(x_nchw, w_mat, b2d):
    """Conv2d(16->33, 3x3, stride 2, no padding) followed by ReLU."""
    # --- glue: single-op im2col ----------------------------------------------
    # (N, HO, WO, CIN*KH*KW); column order is cin-major, then (kh, kw).
    patches = jax.lax.conv_general_dilated_patches(
        x_nchw, (KH, KW), (STRIDE, STRIDE), "VALID",
        dimension_numbers=("NCHW", "OIHW", "NHWC"))
    # Pad M to a sublane multiple and cast to bf16 (fuses into one small op).
    patches = jnp.pad(patches.reshape(NP, K), ((0, NP_PAD - NP), (0, 0)))
    patches = patches.astype(jnp.bfloat16)

    # --- hot path: one Pallas GEMM + bias + ReLU (no grid, whole tiles) ------
    out_flat = pl.pallas_call(
        conv_gemm_kernel,
        out_shape=jax.ShapeDtypeStruct((NP_PAD, COUT_PAD), jnp.float32),
        in_specs=[
            pl.BlockSpec(memory_space=pltpu.MemorySpace.VMEM),
            pl.BlockSpec(memory_space=pltpu.MemorySpace.VMEM),
            pl.BlockSpec(memory_space=pltpu.MemorySpace.VMEM),
        ],
        out_specs=pl.BlockSpec(memory_space=pltpu.MemorySpace.VMEM),
    )(patches, w_mat, b2d)

    # --- glue: drop padding, back to PyTorch's NCHW output layout ------------
    out_nhwc = out_flat[:NP, :COUT].reshape(N, HO, WO, COUT)
    return jnp.transpose(out_nhwc, (0, 3, 1, 2))                       # (N, COUT, HO, WO)


if __name__ == "__main__":
    key = jax.random.PRNGKey(0)
    kx, kw, kb = jax.random.split(key, 3)

    # Deterministic parameter init (same shapes / init style as nn.Conv2d).
    fan_in = CIN * KH * KW
    bound = 1.0 / jnp.sqrt(float(fan_in))
    w = jax.random.uniform(kw, (COUT, CIN, KH, KW), jnp.float32, -bound, bound)
    b = jax.random.uniform(kb, (COUT,), jnp.float32, -bound, bound)

    # One-time parameter layout (not in the per-call path).
    w_mat, b2d = prepare_conv_params(w, b)
    w_mat, b2d = jax.block_until_ready((w_mat, b2d))

    # Deterministic input, NCHW like the PyTorch module.
    x = jax.random.normal(kx, (N, CIN, H, W), jnp.float32)

    fwd = jax.jit(conv2d_relu_pallas)
    out = fwd(x, w_mat, b2d)
    out = jax.block_until_ready(out)

    assert out.shape == (N, COUT, HO, WO), out.shape

    # Sanity check against XLA's convolution (bf16 operands => loose tolerance).
    ref = jax.lax.conv_general_dilated(
        x, w, window_strides=(STRIDE, STRIDE), padding="VALID",
        dimension_numbers=("NCHW", "OIHW", "NCHW"),
    )
    ref = jnp.maximum(ref + b.reshape(1, COUT, 1, 1), 0.0)
    assert jnp.allclose(out, ref, rtol=1e-2, atol=1e-2), float(
        jnp.max(jnp.abs(out - ref))
    )

    print("KERNEL_OK")
</pallas_src>

<mosaic_0001>
module attributes {stable_mosaic.version = 11 : i64} {
  func.func @conv_gemm_kernel(%arg0: memref<104x144xbf16, #tpu.memory_space<vmem>>, %arg1: memref<144x128xbf16, #tpu.memory_space<vmem>>, %arg2: memref<1x128xf32, #tpu.memory_space<vmem>>, %arg3: memref<104x128xf32, #tpu.memory_space<vmem>>) attributes {dimension_semantics = [], scalar_prefetch = 0 : i64, scratch_operands = 0 : i64, tpu.core_type = #tpu.core_type<tc>} {
    %c0 = arith.constant 0 : index
    %c0_0 = arith.constant 0 : index
    %0 = vector.load %arg0[%c0, %c0_0] : memref<104x144xbf16, #tpu.memory_space<vmem>>, vector<104x144xbf16>
    %c0_1 = arith.constant 0 : index
    %c0_2 = arith.constant 0 : index
    %1 = vector.load %arg1[%c0_1, %c0_2] : memref<144x128xbf16, #tpu.memory_space<vmem>>, vector<144x128xbf16>
    %cst = arith.constant dense<0.000000e+00> : vector<104x128xf32>
    %2 = tpu.matmul %0, %1, %cst {dimension_numbers = #tpu.dot_dimension_numbers<[1], [0], [0], [1], [0, 0, 1, 1], [], []>} : vector<104x144xbf16>, vector<144x128xbf16>, vector<104x128xf32> -> vector<104x128xf32>
    %c0_3 = arith.constant 0 : index
    %c0_4 = arith.constant 0 : index
    %3 = vector.load %arg2[%c0_3, %c0_4] : memref<1x128xf32, #tpu.memory_space<vmem>>, vector<1x128xf32>
    %4 = vector.broadcast %3 : vector<1x128xf32> to vector<104x128xf32>
    %5 = arith.addf %2, %4 : vector<104x128xf32>
    %cst_5 = arith.constant 0.000000e+00 : f32
    %6 = vector.broadcast %cst_5 : f32 to vector<104x128xf32>
    %7 = arith.maximumf %5, %6 : vector<104x128xf32>
    %c0_6 = arith.constant 0 : index
    %c0_7 = arith.constant 0 : index
    %8 = vector.load %arg3[%c0_6, %c0_7] : memref<104x128xf32, #tpu.memory_space<vmem>>, vector<104x128xf32>
    tpu.vector_store %arg3[%c0_6, %c0_7], %7 {strides = array<i32>} : memref<104x128xf32, #tpu.memory_space<vmem>>, vector<104x128xf32>,
    return
  }
}

</mosaic_0001>

<bundles_post_ra>
// kernel: conv2d_relu_pallas.1
= control target key start
LH: loop header
LB: loop body
LE: loop exit
PB: predicated region body
PF: predicated region fallthrough
CT: control target
= control target key end

     0   :  { %v386_v0 = vmov 0   ;;  %vm167_vm0 = vcmask 130048   ;;  %s537_s1 = inlined_call_operand.vmem [shape: bf16[144,128], index: 1, kind: input, shape index: {}]   ;;  %s538_s0 = inlined_call_operand.vmem [shape: bf16[104,144], index: 0, kind: input, shape index: {}]   ;;  %s539_s2 = inlined_call_operand.vmem [shape: f32[1,128], index: 2, kind: input, shape index: {}]   ;;  %s540_s3 = inlined_call_operand.vmem [shape: f32[104,128], index: 3, kind: output, shape index: {}]  }
   0x1   :  { %189 = vmatprep.subr.bf16.mxu0 %v386_v0  ;;  %v357_v1 = vld [vmem:[%s537_s1 + $0x38] sm:$0xff]   ;;  %338 = vmatprep.subr.bf16.mxu1 %v386_v0  ;;  %v358_v2 = vld [vmem:[%s537_s1 + $0x30] sm:$0xff]   ;;  %v359_v3 = vld [vmem:[%s537_s1 + $0x28] sm:$0xff]  }
   0x2   :  { %190 = vmatpush1.bf16.msra.mxu0 %v357_v1  ;;  %347 = vmatpush1.bf16.msra.mxu1 %v357_v1  ;;  %v360_v4 = vld [vmem:[%s537_s1 + $0x20] sm:$0xff]   ;;  %v361_v7 = vld [vmem:[%s537_s1 + $0x18] sm:$0xff]   ;;  %v362_v8 = vld [vmem:[%s537_s1 + $0x10] sm:$0xff]  }
   0x3   :  { %191 = vmatprep.subr.bf16.mxu0 %v386_v0  ;;  %339 = vmatprep.subr.bf16.mxu1 %v386_v0  ;;  %v368_v5 = vld [vmem:[%s538_s0 + $0x4] ss:$8 sps:$4 sm:$0xff]   ;;  %v366_v12 = vld [vmem:[%s538_s0] ss:$8 sps:$4 sm:$0xff]   ;;  %v372_v14 = vld [vmem:[%s538_s0 + $0x14] ss:$8 sps:$4 sm:$0xff]  }
   0x4   :  { %v371_v6 = vld [vmem:[%s538_s0 + $0x44] ss:$8 sps:$4 sm:$0xff]   ;;  %331 = vmatprep.mubr.msk.bf16.mxu0 %vm167_vm0, %v368_v5  ;;  %v369_v13 = vld [vmem:[%s538_s0 + $0x40] ss:$8 sps:$4 sm:$0xff]   ;;  %v375_v15 = vld [vmem:[%s538_s0 + $0x54] ss:$8 sps:$4 sm:$0xff]  }
   0x5   :  { %335 = vmatprep.mubr.msk.bf16.mxu1 %vm167_vm0, %v371_v6  ;;  %v363_v9 = vld [vmem:[%s537_s1 + $0x8] sm:$0xff]   ;;  %v364_v10 = vld [vmem:[%s537_s1] sm:$0xff]   ;;  %v374_v17 = vld [vmem:[%s538_s0 + $0x10] ss:$8 sps:$4 sm:$0xff]  }
   0x6   :  { %192 = vmatpush1.bf16.msra.mxu0 %v358_v2  ;;  %348 = vmatpush1.bf16.msra.mxu1 %v358_v2  ;;  %v365_v11 = vld [vmem:[%s537_s1 + $0x40] sm:$0xff]   ;;  %v377_v18 = vld [vmem:[%s538_s0 + $0x50] ss:$8 sps:$4 sm:$0xff]   ;;  %v383_v23 = vld [vmem:[%s538_s0 + $0x34] ss:$8 sps:$4 sm:$0xff]  }
   0x7   :  { %193 = vmatprep.subr.bf16.mxu0 %v386_v0  ;;  %340 = vmatprep.subr.bf16.mxu1 %v386_v0  ;;  %v27_v16 = vld [vmem:[%s538_s0 + $0x60] sm:$0xff]  ;;  %v385_v24 = vld [vmem:[%s538_s0 + $0x30] ss:$8 sps:$4 sm:$0xff]  }
   0x8   :  { %v378_v19 = vld [vmem:[%s538_s0 + $0x24] ss:$8 sps:$4 sm:$0xff]   ;;  %v321_v20 = vcombine.high %v27_v16, %v27_v16  ;;  %v380_v21 = vld [vmem:[%s538_s0 + $0x20] ss:$8 sps:$4 sm:$0xff]   ;;  %v320_v22 = vcombine.low %v27_v16, %v27_v16 }
   0x9   :  { %v483_v25 = vld [vmem:[%s539_s2] ss:$0 sm:$0xff] }
   0xa   :  { %194 = vmatpush1.bf16.msra.mxu0 %v359_v3  ;;  %349 = vmatpush1.bf16.msra.mxu1 %v359_v3 }
   0xb   :  { %195 = vmatprep.subr.bf16.mxu0 %v386_v0  ;;  %341 = vmatprep.subr.bf16.mxu1 %v386_v0 }
   0xe   :  { %196 = vmatpush1.bf16.msra.mxu0 %v360_v4  ;;  %350 = vmatpush1.bf16.msra.mxu1 %v360_v4 }
   0xf   :  { %197 = vmatprep.subr.bf16.mxu0 %v386_v0  ;;  %342 = vmatprep.subr.bf16.mxu1 %v386_v0 }
  0x12   :  { %198 = vmatpush1.bf16.msra.mxu0 %v361_v7  ;;  %351 = vmatpush1.bf16.msra.mxu1 %v361_v7 }
  0x13   :  { %199 = vmatprep.subr.bf16.mxu0 %v386_v0  ;;  %343 = vmatprep.subr.bf16.mxu1 %v386_v0 }
  0x16   :  { %200 = vmatpush1.bf16.msra.mxu0 %v362_v8  ;;  %352 = vmatpush1.bf16.msra.mxu1 %v362_v8 }
  0x17   :  { %201 = vmatprep.subr.bf16.mxu0 %v386_v0  ;;  %344 = vmatprep.subr.bf16.mxu1 %v386_v0 }
  0x1a   :  { %202 = vmatpush1.bf16.msra.mxu0 %v363_v9  ;;  %353 = vmatpush1.bf16.msra.mxu1 %v363_v9 }
  0x1b   :  { %203 = vmatprep.subr.bf16.mxu0 %v386_v0  ;;  %345 = vmatprep.subr.bf16.mxu1 %v386_v0 }
  0x1e   :  { %204 = vmatpush1.bf16.msra.mxu0 %v364_v10  ;;  %354 = vmatpush1.bf16.msra.mxu1 %v364_v10 }
  0x1f   :  { %219 = vmatprep.subr.bf16.mxu0 %v386_v0  ;;  %346 = vmatprep.subr.bf16.mxu1 %v386_v0 }
  0x22   :  { %220 = vmatpush2.bf16.msra.mxu0 %v365_v11  ;;  %355 = vmatpush2.bf16.msra.mxu1 %v365_v11 }
  0x25   :  { %222 = vmatmul.mubr.bf16.vlgmr.msra.gmra.mxu0 %v366_v12  ;;  %254 = vmatmul.mubr.bf16.vlgmr.msra.gmra.mxu1 %v369_v13 }
  0x26   :  { %332 = vmatprep.mubr.msk.bf16.mxu0 %vm167_vm0, %v372_v14  ;;  %336 = vmatprep.mubr.msk.bf16.mxu1 %vm167_vm0, %v375_v15 }
  0x2d   :  { %230 = vmatmul.mubr.bf16.gmra.mxu0 %v374_v17  ;;  %262 = vmatmul.mubr.bf16.gmra.mxu1 %v377_v18 }
  0x2e   :  { %333 = vmatprep.mubr.msk.bf16.mxu0 %vm167_vm0, %v378_v19  ;;  %337 = vmatprep.mubr.msk.bf16.mxu1 %vm167_vm0, %v321_v20 }
  0x35   :  { %238 = vmatmul.mubr.bf16.gmra.mxu0 %v380_v21  ;;  %270 = vmatmul.mubr.bf16.gmra.mxu1 %v320_v22 }
  0x36   :  { %334 = vmatprep.mubr.msk.bf16.mxu0 %vm167_vm0, %v383_v23 }
  0x3d   :  { %246 = vmatmul.mubr.bf16.gmra.mxu0 %v385_v24 }
  0xe5   :  { %v223_v26 = vpop.f32.mrf.mxu0  ;;  %v255_v27 = vpop.f32.mrf.mxu1 }
  0xe6   :  { %v224_v28 = vadd.f32 %v483_v25, %v223_v26  ;;  %v256_v29 = vadd.f32 %v483_v25, %v255_v27 }
  0xe7   :  { %v225_v30 = vpop.f32.mrf.mxu0  ;;  %v257_v31 = vpop.f32.mrf.mxu1 }
  0xe8   :  { %v277_v32 = vmax.f32 %v224_v28, 0.0  ;;  %v285_v33 = vmax.f32 %v256_v29, 0.0 }
  0xe9   :  { %v226_v34 = vpop.f32.mrf.mxu0  ;;  %v258_v35 = vpop.f32.mrf.mxu1 }
  0xea   :  { %290 = vst [vmem:[%s540_s3] sm:$0xff] %v277_v32  ;;  %v227_v36 = vadd.f32 %v483_v25, %v226_v34  ;;  %298 = vst [vmem:[%s540_s3 + $0x40] sm:$0xff] %v285_v33  ;;  %v259_v37 = vadd.f32 %v483_v25, %v258_v35 }
  0xeb   :  { %v228_v38 = vpop.f32.mrf.mxu0  ;;  %v260_v39 = vpop.f32.mrf.mxu1 }
  0xec   :  { %v278_v40 = vmax.f32 %v227_v36, 0.0  ;;  %v286_v41 = vmax.f32 %v259_v37, 0.0 }
  0xed   :  { %v231_v42 = vpop.f32.mrf.mxu0  ;;  %v263_v43 = vpop.f32.mrf.mxu1 }
  0xee   :  { %291 = vst [vmem:[%s540_s3 + $0x8] sm:$0xff] %v278_v40  ;;  %v232_v44 = vadd.f32 %v483_v25, %v231_v42  ;;  %299 = vst [vmem:[%s540_s3 + $0x48] sm:$0xff] %v286_v41  ;;  %v264_v45 = vadd.f32 %v483_v25, %v263_v43 }
  0xef   :  { %v233_v46 = vpop.f32.mrf.mxu0  ;;  %v265_v47 = vpop.f32.mrf.mxu1 }
  0xf0   :  { %v279_v48 = vmax.f32 %v232_v44, 0.0  ;;  %v287_v49 = vmax.f32 %v264_v45, 0.0 }
  0xf1   :  { %v234_v50 = vpop.f32.mrf.mxu0  ;;  %v266_v51 = vpop.f32.mrf.mxu1 }
  0xf2   :  { %292 = vst [vmem:[%s540_s3 + $0x10] sm:$0xff] %v279_v48  ;;  %v235_v52 = vadd.f32 %v483_v25, %v234_v50  ;;  %300 = vst [vmem:[%s540_s3 + $0x50] sm:$0xff] %v287_v49  ;;  %v267_v53 = vadd.f32 %v483_v25, %v266_v51 }
  0xf3   :  { %v236_v54 = vpop.f32.mrf.mxu0  ;;  %v268_v55 = vpop.f32.mrf.mxu1 }
  0xf4   :  { %v280_v56 = vmax.f32 %v235_v52, 0.0  ;;  %v288_v57 = vmax.f32 %v267_v53, 0.0 }
  0xf5   :  { %v239_v58 = vpop.f32.mrf.mxu0  ;;  %v271_v59 = vpop.f32.mrf.mxu1 }
  0xf6   :  { %293 = vst [vmem:[%s540_s3 + $0x18] sm:$0xff] %v280_v56  ;;  %v240_v60 = vadd.f32 %v483_v25, %v239_v58  ;;  %301 = vst [vmem:[%s540_s3 + $0x58] sm:$0xff] %v288_v57  ;;  %v272_v61 = vadd.f32 %v483_v25, %v271_v59 }
  0xf7   :  { %v241_v62 = vpop.f32.mrf.mxu0  ;;  %v273_v63 = vpop.f32.mrf.mxu1 }
  0xf8   :  { %v281_v0 = vmax.f32 %v240_v60, 0.0  ;;  %v289_v1 = vmax.f32 %v272_v61, 0.0 }
  0xf9   :  { %v242_v2 = vpop.f32.mrf.mxu0  ;;  %v274_v3 = vpop.f32.mrf.mxu1 }
  0xfa   :  { %294 = vst [vmem:[%s540_s3 + $0x20] sm:$0xff] %v281_v0  ;;  %v243_v4 = vadd.f32 %v483_v25, %v242_v2  ;;  %302 = vst [vmem:[%s540_s3 + $0x60] sm:$0xff] %v289_v1 }
  0xfb   :  { %v244_v5 = vpop.f32.mrf.mxu0  ;;  %v275_v6 = vpop.f32.mrf.mxu1 }
  0xfc   :  { %v282_v7 = vmax.f32 %v243_v4, 0.0 }
  0xfd   :  { %v247_v8 = vpop.f32.mrf.mxu0 }
  0xfe   :  { %295 = vst [vmem:[%s540_s3 + $0x28] sm:$0xff] %v282_v7  ;;  %v248_v9 = vadd.f32 %v483_v25, %v247_v8 }
  0xff   :  { %v249_v10 = vpop.f32.mrf.mxu0 }
 0x100   :  { %v283_v11 = vmax.f32 %v248_v9, 0.0 }
 0x101   :  { %v250_v12 = vpop.f32.mrf.mxu0 }
 0x102   :  { %296 = vst [vmem:[%s540_s3 + $0x30] sm:$0xff] %v283_v11  ;;  %v251_v13 = vadd.f32 %v483_v25, %v250_v12 }
 0x103   :  { %v252_v14 = vpop.f32.mrf.mxu0 }
 0x104   :  { %v284_v15 = vmax.f32 %v251_v13, 0.0 }
 0x106   :  { %297 = vst [vmem:[%s540_s3 + $0x38] sm:$0xff] %v284_v15 }

</bundles_post_ra>
